<compile_context>
chip_gen: v6e
topology: v6e:2x2x1
jax: 0.10.0
libtpu: 0.0.40
codegen_flags: <defaults>
</compile_context>

<pallas_src>
import jax
import jax.numpy as jnp
from jax.experimental import pallas as pl
from jax.experimental.pallas import tpu as pltpu


def _make_kernel(activation: str, act_bias: float):
    def kernel(xt_ref, w1_ref, b1_ref, w2_ref, b2_ref, o_ref):
        # First linear: h^T = W1 @ x^T on the MXU, f32 accumulate; bias/ReLU in f32
        # (so bf16 never touches the VPU/EUP -> safe on v5e too).
        h = jnp.dot(w1_ref[...], xt_ref[...], preferred_element_type=jnp.float32)
        h = jnp.maximum(h + b1_ref[...], 0.0)                               # (C, tile_n)
        # Second linear (C -> 1): broadcast-multiply + sublane reduce instead of a
        # degenerate 1-column MXU matmul. b2 is a scalar read from SMEM.
        y = jnp.sum(h * w2_ref[...], axis=0, keepdims=True) + b2_ref[0]     # (1, tile_n)
        if activation == "sigmoid":
            # exp on the EUP + approx reciprocal on the EUP -> no VALU divide.
            out = pl.reciprocal(1.0 + jnp.exp(-y), approx=True)
        elif activation == "softplus":
            # stable softplus (matches torch.nn.Softplus) plus the module's bias.
            out = jnp.maximum(y, 0.0) + jnp.log(1.0 + jnp.exp(-jnp.abs(y))) + act_bias
        else:  # "no_act"
            out = y
        o_ref[...] = out.astype(o_ref.dtype)

    return kernel


def dynamic_network_forward(features, w1, b1, w2, b2, *, activation="sigmoid",
                            act_bias=0.1, tile_n=2048, input_dtype=jnp.bfloat16):
    """Pallas TPU forward of DynamicNetwork.

    features : (N, C) float32
    w1       : (C, C)  torch Linear(in_ch, in_ch).weight, (out, in) layout
    b1       : (C,)    torch Linear(in_ch, in_ch).bias
    w2       : (1, C)  torch Linear(in_ch, 1).weight
    b2       : (1,)    torch Linear(in_ch, 1).bias
    returns  : (N, 1) float32
    """
    assert activation in ("sigmoid", "softplus", "no_act")
    n, c = features.shape

    # Rows map to lanes: pad N to a lane multiple, pick a large lane tile
    # (per-grid-step overhead ~0.35us dominates this tiny MLP otherwise), then
    # pad N to a tile multiple so no tail masking is needed.
    n_pad = pl.cdiv(n, 128) * 128
    tile = min(int(tile_n), n_pad)
    n_pad = pl.cdiv(n_pad, tile) * tile
    grid = (n_pad // tile,)

    # bf16 input stream halves HBM traffic on the dominant transfer (x); weights
    # are tiny and resident. All post-MXU math stays in f32.
    x = features.astype(input_dtype)
    if n_pad != n:
        x = jnp.pad(x, ((0, n_pad - n), (0, 0)))
    xt = x.T                                            # (C, n_pad), lane-dense
    w1k = w1.astype(input_dtype)                        # (C, C): h^T = W1 @ x^T
    b1k = b1.reshape(c, 1).astype(jnp.float32)          # broadcasts over lanes
    w2k = w2.reshape(c, 1).astype(jnp.float32)          # (1, C) -> (C, 1) column
    b2k = b2.reshape(1).astype(jnp.float32)             # scalar, lives in SMEM

    out = pl.pallas_call(
        _make_kernel(activation, float(act_bias)),
        out_shape=jax.ShapeDtypeStruct((1, n_pad), jnp.float32),
        grid_spec=pltpu.PrefetchScalarGridSpec(
            num_scalar_prefetch=0,
            grid=grid,
            in_specs=[
                pl.BlockSpec((c, tile), lambda i: (0, i)),          # x^T tile (pipelined)
                pl.BlockSpec((c, c), lambda i: (0, 0)),             # W1 (resident)
                pl.BlockSpec((c, 1), lambda i: (0, 0)),             # b1 column (resident)
                pl.BlockSpec((c, 1), lambda i: (0, 0)),             # w2 column (resident)
                pl.BlockSpec(memory_space=pltpu.MemorySpace.SMEM),  # b2 scalar
            ],
            out_specs=pl.BlockSpec((1, tile), lambda i: (0, i)),    # lane-dense output
        ),
        compiler_params=pltpu.CompilerParams(
            # Tile axis is fully parallel -> megacore sharding on v7x
            # (pick tile_n <= N/2 there so the grid has >= 2 steps).
            dimension_semantics=("parallel",),
        ),
    )(xt, w1k, b1k, w2k, b2k)

    return out[0, :n].reshape(n, 1).astype(jnp.float32)


def init_params(in_ch, key):
    """Parameters matching DynamicNetwork.__init__/init() (torch layouts).

    net[0] = Linear(in_ch, in_ch): random stand-in for torch's default init.
    net[2] = Linear(in_ch, 1): weight and bias zero-initialized by module.init().
    """
    k1, k2 = jax.random.split(key)
    bound = 1.0 / jnp.sqrt(jnp.float32(in_ch))
    w1 = jax.random.uniform(k1, (in_ch, in_ch), jnp.float32, -bound, bound)
    b1 = jax.random.uniform(k2, (in_ch,), jnp.float32, -bound, bound)
    w2 = jnp.zeros((1, in_ch), jnp.float32)
    b2 = jnp.zeros((1,), jnp.float32)
    return w1, b1, w2, b2


def reference_forward(features, w1, b1, w2, b2, activation="sigmoid", act_bias=0.1,
                      input_dtype=jnp.bfloat16):
    x = features.astype(input_dtype)
    h = jnp.dot(x, w1.astype(input_dtype).T, preferred_element_type=jnp.float32)
    h = jnp.maximum(h + b1.reshape(1, -1), 0.0)
    y = h @ w2.reshape(-1, 1).astype(jnp.float32) + b2.reshape(1, 1)
    if activation == "sigmoid":
        return jax.nn.sigmoid(y)
    if activation == "softplus":
        return jax.nn.softplus(y) + act_bias
    return y


if __name__ == "__main__":
    in_ch = 32
    n = 256

    key = jax.random.PRNGKey(0)
    k_x, k_w1, k_b1, k_w2, k_b2 = jax.random.split(key, 5)
    features = jax.random.normal(k_x, (n, in_ch), jnp.float32)

    # Random non-zero parameters so the check exercises the full dataflow
    # (the module's own init() zeroes the last layer; checked separately below).
    bound = 1.0 / jnp.sqrt(jnp.float32(in_ch))
    w1 = jax.random.uniform(k_w1, (in_ch, in_ch), jnp.float32, -bound, bound)
    b1 = jax.random.uniform(k_b1, (in_ch,), jnp.float32, -bound, bound)
    w2 = jax.random.uniform(k_w2, (1, in_ch), jnp.float32, -bound, bound)
    b2 = jax.random.uniform(k_b2, (1,), jnp.float32, -bound, bound)

    out = jax.block_until_ready(dynamic_network_forward(features, w1, b1, w2, b2))
    ref = reference_forward(features, w1, b1, w2, b2)
    assert out.shape == (n, 1)
    assert jnp.allclose(out, ref, atol=2e-3, rtol=2e-3), float(jnp.max(jnp.abs(out - ref)))

    # Module-faithful init: last Linear zero-initialized -> sigmoid(0) == 0.5.
    w1z, b1z, w2z, b2z = init_params(in_ch, jax.random.PRNGKey(1))
    out0 = jax.block_until_ready(dynamic_network_forward(features, w1z, b1z, w2z, b2z))
    assert jnp.allclose(out0, 0.5, atol=1e-3)

    print("KERNEL_OK")
</pallas_src>

<mosaic_0001>
module attributes {stable_mosaic.version = 11 : i64} {
  func.func @kernel(%arg0: i32, %arg1: memref<32x256xbf16, #tpu.memory_space<vmem>>, %arg2: memref<32x32xbf16, #tpu.memory_space<vmem>>, %arg3: memref<32x1xf32, #tpu.memory_space<vmem>>, %arg4: memref<32x1xf32, #tpu.memory_space<vmem>>, %arg5: memref<1xf32, #tpu.memory_space<smem>>, %arg6: memref<1x256xf32, #tpu.memory_space<vmem>>) attributes {dimension_semantics = [#tpu.dimension_semantics<parallel>], iteration_bounds = array<i64: 1>, scalar_prefetch = 0 : i64, scratch_operands = 0 : i64, tpu.core_type = #tpu.core_type<tc>, window_params = [{transform_indices = @transform_0, window_bounds = array<i64: 32, 256>}, {pipeline_mode = #tpu.pipeline_mode<synchronous>, transform_indices = @transform_1, window_bounds = array<i64: 32, 32>}, {pipeline_mode = #tpu.pipeline_mode<synchronous>, transform_indices = @transform_2, window_bounds = array<i64: 32, 1>}, {pipeline_mode = #tpu.pipeline_mode<synchronous>, transform_indices = @transform_3, window_bounds = array<i64: 32, 1>}, {transform_indices = @transform_4, window_bounds = array<i64: 1>}, {transform_indices = @transform_5, window_bounds = array<i64: 1, 256>}]} {
    %c0 = arith.constant 0 : index
    %c0_0 = arith.constant 0 : index
    %0 = vector.load %arg2[%c0, %c0_0] : memref<32x32xbf16, #tpu.memory_space<vmem>>, vector<32x32xbf16>
    %c0_1 = arith.constant 0 : index
    %c0_2 = arith.constant 0 : index
    %1 = vector.load %arg1[%c0_1, %c0_2] : memref<32x256xbf16, #tpu.memory_space<vmem>>, vector<32x256xbf16>
    %cst = arith.constant dense<0.000000e+00> : vector<32x256xf32>
    %2 = tpu.matmul %0, %1, %cst {dimension_numbers = #tpu.dot_dimension_numbers<[1], [0], [0], [1], [0, 0, 1, 1], [], []>} : vector<32x32xbf16>, vector<32x256xbf16>, vector<32x256xf32> -> vector<32x256xf32>
    %c0_3 = arith.constant 0 : index
    %c0_4 = arith.constant 0 : index
    %3 = vector.load %arg3[%c0_3, %c0_4] : memref<32x1xf32, #tpu.memory_space<vmem>>, vector<32x1xf32>
    %4 = vector.broadcast %3 : vector<32x1xf32> to vector<32x256xf32>
    %5 = arith.addf %2, %4 : vector<32x256xf32>
    %cst_5 = arith.constant 0.000000e+00 : f32
    %6 = vector.broadcast %cst_5 : f32 to vector<32x256xf32>
    %7 = arith.maximumf %5, %6 : vector<32x256xf32>
    %c0_6 = arith.constant 0 : index
    %c0_7 = arith.constant 0 : index
    %8 = vector.load %arg4[%c0_6, %c0_7] : memref<32x1xf32, #tpu.memory_space<vmem>>, vector<32x1xf32>
    %9 = vector.broadcast %8 : vector<32x1xf32> to vector<32x256xf32>
    %10 = arith.mulf %7, %9 : vector<32x256xf32>
    %cst_8 = arith.constant dense<0.000000e+00> : vector<256xf32>
    %11 = vector.multi_reduction <add>, %10, %cst_8 [0] : vector<32x256xf32> to vector<256xf32>
    %12 = vector.shape_cast %11 : vector<256xf32> to vector<1x256xf32>
    %c0_9 = arith.constant 0 : index
    %13 = memref.load %arg5[%c0_9] : memref<1xf32, #tpu.memory_space<smem>>
    %14 = vector.broadcast %13 : f32 to vector<1x256xf32>
    %15 = arith.addf %12, %14 : vector<1x256xf32>
    %cst_10 = arith.constant 0.000000e+00 : f32
    %16 = vector.broadcast %cst_10 : f32 to vector<1x256xf32>
    %17 = arith.subf %16, %15 : vector<1x256xf32>
    %18 = math.exp %17 : vector<1x256xf32>
    %cst_11 = arith.constant 1.000000e+00 : f32
    %19 = vector.broadcast %cst_11 : f32 to vector<1x256xf32>
    %20 = arith.addf %19, %18 : vector<1x256xf32>
    %21 = tpu.reciprocal %20 {approx = true} : vector<1x256xf32> -> vector<1x256xf32>
    %c0_12 = arith.constant 0 : index
    %c0_13 = arith.constant 0 : index
    %22 = vector.load %arg6[%c0_12, %c0_13] : memref<1x256xf32, #tpu.memory_space<vmem>>, vector<1x256xf32>
    tpu.vector_store %arg6[%c0_12, %c0_13], %21 {strides = array<i32>} : memref<1x256xf32, #tpu.memory_space<vmem>>, vector<1x256xf32>,
    return
  }
  func.func @transform_0(%arg0: i32) -> (i32, i32) {
    %c0_i32 = arith.constant 0 : i32
    %c0_i32_0 = arith.constant 0 : i32
    return %c0_i32, %arg0 : i32, i32
  }
  func.func @transform_1(%arg0: i32) -> (i32, i32) {
    %c0_i32 = arith.constant 0 : i32
    %c0_i32_0 = arith.constant 0 : i32
    %c0_i32_1 = arith.constant 0 : i32
    return %c0_i32, %c0_i32_0 : i32, i32
  }
  func.func @transform_2(%arg0: i32) -> (i32, i32) {
    %c0_i32 = arith.constant 0 : i32
    %c0_i32_0 = arith.constant 0 : i32
    %c0_i32_1 = arith.constant 0 : i32
    return %c0_i32, %c0_i32_0 : i32, i32
  }
  func.func @transform_3(%arg0: i32) -> (i32, i32) {
    %c0_i32 = arith.constant 0 : i32
    %c0_i32_0 = arith.constant 0 : i32
    %c0_i32_1 = arith.constant 0 : i32
    return %c0_i32, %c0_i32_0 : i32, i32
  }
  func.func @transform_4(%arg0: i32) -> i32 {
    %c0_i32 = arith.constant 0 : i32
    %c0_i32_0 = arith.constant 0 : i32
    return %c0_i32 : i32
  }
  func.func @transform_5(%arg0: i32) -> (i32, i32) {
    %c0_i32 = arith.constant 0 : i32
    %c0_i32_0 = arith.constant 0 : i32
    return %c0_i32, %arg0 : i32, i32
  }
}

</mosaic_0001>

<bundles_post_ra>
// kernel: tpu_custom_call.1
= control target key start
LH: loop header
LB: loop body
LE: loop exit
PB: predicated region body
PF: predicated region fallthrough
CT: control target
= control target key end

     0   :  { %v309_v2 = vmov 0   ;;  %vm85_vm0 = vcmask 261120   ;;  %s390_s0 = inlined_call_operand.vmem [shape: bf16[32,256], index: 0, kind: input, shape index: {}]   ;;  %s391_s1 = inlined_call_operand.vmem [shape: bf16[32,32], index: 1, kind: input, shape index: {}]   ;;  %s392_s2 = inlined_call_operand.vmem [shape: f32[32,1], index: 2, kind: input, shape index: {}]   ;;  %s393_s3 = inlined_call_operand.vmem [shape: f32[32,1], index: 3, kind: input, shape index: {}]   ;;  %s394_s4 = inlined_call_operand.<no memory space> [shape: f32[1], index: 4, kind: input, shape index: {}]   ;;  %s395_s5 = inlined_call_operand.hbm [shape: f32[1,256], index: 5, kind: output, shape index: {}]  }
   0x1   :  { %v271_v0 = vld [vmem:[%s390_s0 + $0x14] ss:$8 sps:$4 sm:$0xff]   ;;  %v273_v1 = vld [vmem:[%s390_s0 + $0x10] ss:$8 sps:$4 sm:$0xff]   ;;  %124 = vmatprep.mubr.bf16.mxu0 %v309_v2  ;;  %134 = vmatprep.mubr.bf16.mxu1 %v309_v2  ;;  %v274_v3 = vld [vmem:[%s390_s0 + $0x4] ss:$8 sps:$4 sm:$0xff]  }
   0x2   :  { %104 = vmatprep.subr.bf16.mxu0 %v271_v0  ;;  %262 = vmatprep.subr.bf16.mxu1 %v271_v0  ;;  %v276_v4 = vld [vmem:[%s390_s0] ss:$8 sps:$4 sm:$0xff]   ;;  %v33_v6 = vld [vmem:[%s392_s2 + $0x10] sm:$0xff] }
   0x3   :  { %105 = vmatpush1.bf16.msra.mxu0 %v273_v1  ;;  %264 = vmatpush1.bf16.msra.mxu1 %v273_v1  ;;  %v31_v5 = vld [vmem:[%s392_s2] sm:$0xff]  ;;  %v278_v8 = vld [vmem:[%s391_s1 + $0x8] sm:$0xff]  }
   0x4   :  { %106 = vmatprep.subr.bf16.mxu0 %v274_v3  ;;  %263 = vmatprep.subr.bf16.mxu1 %v274_v3  ;;  %v277_v7 = vld [vmem:[%s391_s1] sm:$0xff]  }
   0x5   :  { %269 = vset.pattern.permute.xlu0 %v309_v2  ;;  %270 = vset.pattern.permute.xlu1 %v309_v2 }
   0x6   :  { %37 = vperm.xlu0 %269, %v31_v5   ;;  %47 = vperm.xlu1 %270, %v33_v6  }
   0x7   :  { %107 = vmatpush1.bf16.msra.mxu0 %v276_v4  ;;  %265 = vmatpush1.bf16.msra.mxu1 %v276_v4 }
   0x8   :  { %11 = vsyncpa [#allocation4], 0  ;;  %v32_v9 = vld [vmem:[%s392_s2 + $0x8] sm:$0xff]  ;;  %v34_v10 = vld [vmem:[%s392_s2 + $0x18] sm:$0xff]  ;;  %v204_v6 = vstv %s394_s4  ;;  %s311_s4 = smov [#allocation3]  }
   0x9   :  { %v153_v11 = vld [vmem:[%s393_s3] sm:$0xff]  ;;  %v154_v12 = vld [vmem:[%s393_s3 + $0x8] sm:$0xff]  ;;  %v155_v13 = vld [vmem:[%s393_s3 + $0x10] sm:$0xff]  ;;  %s246_s19 = sshll.u32 %s311_s4, 4  ;;  %s247_s19 = int_to_ptr.vmem [resolvable:$true] %s246_s19 }
   0xa   :  { %260 = vmatmul.mubr.msk.bf16.vlgmr.msra.gmra.mxu0 %vm85_vm0, %v277_v7  ;;  %261 = vmatmul.mubr.msk.bf16.vlgmr.msra.gmra.mxu1 %vm85_vm0, %v278_v8  ;;  %v156_v14 = vld [vmem:[%s393_s3 + $0x18] sm:$0xff]  ;;  %s287_s20 = scalar_lea.vmem %s247_s19, 32  ;;  %p292_p1 = scmp.lt.s32.totalorder %s247_s19, %s247_s19 }
   0xb   :  { %42 = vperm.xlu0 %269, %v32_v9   ;;  %52 = vperm.xlu1 %270, %v34_v10   ;;  %p288_p0 = scmp.ne.s32.totalorder %s247_s19, %s287_s20  ;;  %p293_p2 = scmp.lt.s32.totalorder %s287_s20, %s287_s20 }
   0xd   :  { %p294_p3 = por %p293_p2, %p292_p1 }
   0xf   :  { %159 = vperm.xlu0 %269, %v153_v11   ;;  %164 = vperm.xlu1 %270, %v154_v12   ;;  %p295_p4 = pnand %p294_p3, %p288_p0 }
  0x13   :  { %169 = vperm.xlu0 %269, %v155_v13   ;;  %174 = vperm.xlu1 %270, %v156_v14  }
  0x81   :  { %v38_v15 = vpop.permute.xlu0 %37  ;;  %v48_v16 = vpop.permute.xlu1 %47 }
  0x86   :  { %v43_v17 = vpop.permute.xlu0 %42  ;;  %v53_v20 = vpop.permute.xlu1 %52 }
  0x8a   :  { %v160_v28 = vpop.permute.xlu0 %159  ;;  %v165_v35 = vpop.permute.xlu1 %164 }
  0x8e   :  { %v170_v46 = vpop.permute.xlu0 %169  ;;  %v175_v52 = vpop.permute.xlu1 %174 }
  0xca   :  { %v126_v18 = vpop.f32.mrf.mxu0  ;;  %v136_v19 = vpop.f32.mrf.mxu1 }
  0xcb   :  { %v127_v21 = vadd.f32 %v126_v18, %v38_v15  ;;  %v137_v25 = vadd.f32 %v136_v19, %v48_v16 }
  0xcc   :  { %v128_v22 = vpop.f32.mrf.mxu0  ;;  %v138_v23 = vpop.f32.mrf.mxu1 }
  0xcd   :  { %v129_v24 = vadd.f32 %v128_v22, %v38_v15  ;;  %v139_v29 = vadd.f32 %v138_v23, %v48_v16  ;;  %v145_v30 = vmax.f32 %v127_v21, 0.0  ;;  %v149_v39 = vmax.f32 %v137_v25, 0.0 }
  0xce   :  { %v130_v26 = vpop.f32.mrf.mxu0  ;;  %v140_v27 = vpop.f32.mrf.mxu1  ;;  %v223_v22 = vlaneseq }
  0xcf   :  { %v131_v31 = vadd.f32 %v130_v26, %v43_v17  ;;  %v141_v32 = vadd.f32 %v140_v27, %v53_v20  ;;  %v146_v36 = vmax.f32 %v129_v24, 0.0  ;;  %v150_v41 = vmax.f32 %v139_v29, 0.0 }
  0xd0   :  { %v132_v33 = vpop.f32.mrf.mxu0  ;;  %v142_v34 = vpop.f32.mrf.mxu1  ;;  %v177_v43 = vmul.f32 %v160_v28, %v145_v30  ;;  %v181_v50 = vmul.f32 %v170_v46, %v149_v39  ;;  %v224_v24 = vshrl.u32 %v223_v22, 7  ;;  %vm237_vm1 = vcmp.lt.s32.totalorder %v223_v22, 256 }
  0xd1   :  { %v133_v37 = vadd.f32 %v132_v33, %v43_v17  ;;  %v143_v38 = vadd.f32 %v142_v34, %v53_v20  ;;  %v147_v40 = vmax.f32 %v131_v31, 0.0  ;;  %v151_v45 = vmax.f32 %v141_v32, 0.0 }
  0xd2   :  { %v178_v47 = vmul.f32 %v160_v28, %v146_v36  ;;  %v182_v53 = vmul.f32 %v170_v46, %v150_v41  ;;  %v310_v20 = vmov 1966171168  }
  0xd3   :  { %v148_v42 = vmax.f32 %v133_v37, 0.0  ;;  %v179_v44 = vmul.f32 %v165_v35, %v147_v40  ;;  %v152_v49 = vmax.f32 %v143_v38, 0.0  ;;  %v183_v55 = vmul.f32 %v175_v52, %v151_v45 }
  0xd4   :  { %v221_v21 = vunpack.c.l.s4 %v310_v20 }
  0xd5   :  { %v180_v48 = vmul.f32 %v165_v35, %v148_v42  ;;  %v185_v51 = vadd.f32 %v179_v44, %v177_v43  ;;  %v184_v57 = vmul.f32 %v175_v52, %v152_v49 }
  0xd6   :  { %v222_v23 = vunpack.c.0.s8 %v221_v21 }
  0xd7   :  { %v194_v54 = vadd.f32 %v180_v48, %v178_v47  ;;  %v186_v56 = vadd.f32 %v185_v51, %v181_v50 }
  0xd8   :  { %v225_v26 = vsub.s32 %v222_v23, %v224_v24 }
  0xd9   :  { %v195_v58 = vadd.f32 %v194_v54, %v182_v53  ;;  %v187_v59 = vadd.f32 %v186_v56, %v183_v55 }
  0xdb   :  { %v196_v60 = vadd.f32 %v195_v58, %v184_v57  ;;  %v188_v61 = vrot.slane %v187_v59, 4 }
  0xdd   :  { %v197_v62 = vrot.slane %v196_v60, 4  ;;  %v189_v63 = vadd.f32 %v188_v61, %v187_v59 }
  0xdf   :  { %v198_v0 = vadd.f32 %v197_v62, %v196_v60  ;;  %v190_v1 = vrot.slane %v189_v63, 2 }
  0xe1   :  { %v199_v2 = vrot.slane %v198_v0, 2  ;;  %v191_v3 = vadd.f32 %v190_v1, %v189_v63 }
  0xe3   :  { %v200_v4 = vadd.f32 %v199_v2, %v198_v0  ;;  %v192_v5 = vrot.slane %v191_v3, 1 }
  0xe5   :  { %v201_v7 = vrot.slane %v200_v4, 1  ;;  %v193_v8 = vadd.f32 %v192_v5, %v191_v3 }
  0xe7   :  { %v202_v9 = vadd.f32 %v201_v7, %v200_v4  ;;  %v205_v10 = vadd.f32 %v204_v6, %v193_v8 }
  0xe9   :  { %v206_v11 = vadd.f32 %v204_v6, %v202_v9  ;;  %v207_v12 = vsub.f32 0.0, %v205_v10 }
  0xeb   :  { %v208_v13 = vsub.f32 0.0, %v206_v11  ;;  %v209_v14 = vmul.f32 1.442695, %v207_v12 }
  0xed   :  { %v211_v15 = vmul.f32 1.442695, %v208_v13  ;;  %279 = vpow2.f32 %v209_v14 }
  0xef   :  { %281 = vpow2.f32 %v211_v15 }
  0xfa   :  { %v280_v16 = vpop.eup %279 }
  0xfb   :  { %v213_v18 = vadd.f32 1.0, %v280_v16 }
  0xfc   :  { %v282_v17 = vpop.eup %281 }
  0xfd   :  { %v214_v19 = vadd.f32 1.0, %v282_v17  ;;  %283 = vrcp.f32 %v213_v18 }
  0xff   :  { %285 = vrcp.f32 %v214_v19 }
 0x10a   :  { %v284_v25 = vpop.eup %283 }
 0x10c   :  { %v286_v27 = vpop.eup %285 }
 0x10d   :  { %v219_v28 = vcombine.low %v284_v25, %v286_v27 }
 0x10f   :  { %v226_v29 = vrot.slane %v219_v28, %v225_v26 }
 0x111   :  { %v233_v30 = vrot.slane %v226_v29, %v225_v26 }
 0x113   :  { %239 = vst.msk [vmem:[#allocation3] sm:$0x3] %vm237_vm1, %v233_v30 }
 0x114   :  { %298 = shalt.err (!%p295_p4)
}
 0x115   :  { %249 = dma.vmem_to_hbm [thread:$0]  %s247_s19, 32, %s395_s5, [#allocation4]  }
 0x116   :  { %307 = dma.done.wait [#allocation4], 32  }
 0x117   :  { %308 = vsyncadd [#allocation4], 4294967264 }
 0x118   :  { %253 = vsyncpa [#allocation4], 1 }

</bundles_post_ra>
